<compile_context>
chip_gen: v5e
topology: v5e:2x2
jax: 0.10.0
libtpu: 0.0.40
codegen_flags: <defaults>
</compile_context>

<pallas_src>
import math

import jax
import jax.numpy as jnp
from jax.experimental import pallas as pl
from jax.experimental.pallas import tpu as pltpu


def _round_up(x, m):
    return (x + m - 1) // m * m


def _cdiv(a, b):
    return -(-a // b)


def _pad2(x, rows, cols):
    x = jnp.asarray(x)
    return jnp.pad(x, ((0, rows - x.shape[0]), (0, cols - x.shape[1])))


# ---------------------------------------------------------------------------
# Parameter preparation — done ONCE outside the per-call path.
#   w_in : (width, 1)   b_in : (width,)           PyTorch nn.Linear layouts
#   block_params: list of (W.weight, W.bias, V.weight, V.bias) per Block
#   w_out: (out, width) b_out: (out,)
# ---------------------------------------------------------------------------
def prepare_time_params(w_in, b_in, block_params, w_out, b_out,
                        *, param_dtype=jnp.bfloat16):
    # param_dtype=bfloat16: MXU-native operands on v5e/v6e/v7x, halves resident
    # weight VMEM & entry DMA.  Accumulation stays f32 in the kernel.
    assert len(block_params) >= 1, "depth must be >= 1"
    w_in = jnp.asarray(w_in)
    w_out = jnp.asarray(w_out)
    width = w_in.shape[0]
    out = w_out.shape[0]
    depth = len(block_params)

    width_p = _round_up(max(width, 128), 128)   # lane-dense
    out_p = _round_up(max(out, 128), 128)       # lane-dense (unmasked stores)

    win = _pad2(w_in.T.astype(param_dtype), 1, width_p)                       # (1, Wp)
    bin_ = _pad2(jnp.asarray(b_in, jnp.float32).reshape(1, width), 1, width_p)

    wb = jnp.stack([_pad2(jnp.asarray(ww).T.astype(param_dtype), width_p, width_p)
                    for (ww, _, _, _) in block_params])                       # (D, Wp, Wp)
    bw = jnp.stack([_pad2(jnp.asarray(b).reshape(1, width).astype(jnp.float32),
                          1, width_p)
                    for (_, b, _, _) in block_params])                        # (D, 1, Wp)
    vb = jnp.stack([_pad2(jnp.asarray(vw).T.astype(param_dtype), width_p, width_p)
                    for (_, _, vw, _) in block_params])                       # (D, Wp, Wp)
    bv = jnp.stack([_pad2(jnp.asarray(b).reshape(1, width).astype(jnp.float32),
                          1, width_p)
                    for (_, _, _, b) in block_params])                        # (D, 1, Wp)

    wout = _pad2(w_out.T.astype(param_dtype), width_p, out_p)                 # (Wp, Op)
    bout = _pad2(jnp.asarray(b_out, jnp.float32).reshape(1, out), 1, out_p)

    return {
        "win": win, "bin": bin_, "wb": wb, "bw": bw, "vb": vb, "bv": bv,
        "wout": wout, "bout": bout,
        "width": width, "out": out, "depth": depth,
        "width_p": width_p, "out_p": out_p,
    }


# ---------------------------------------------------------------------------
# Fused kernel: one batch tile of the whole Time forward pass.
# ---------------------------------------------------------------------------
def _make_time_kernel(depth, vector_dtype=jnp.float32):
    # vector_dtype controls the tanh-chain / intermediate dtype.
    #   f32 (default): correct & fastest on v5e (no bf16 VPU/EUP there).
    #   bf16: ~2x on the EUP-bound tanh slot on v6e/v7x if accuracy permits.
    def kernel(t_ref, win_ref, bin_ref, wb_ref, bw_ref, vb_ref, bv_ref,
               wout_ref, bout_ref, o_ref):
        # Input embedding Linear(1, width): an outer product -> pure VPU work.
        t = t_ref[...].astype(jnp.float32)                                 # (tm, 1)
        h = jnp.tanh(t * win_ref[...].astype(jnp.float32)
                     + bin_ref[...]).astype(vector_dtype)                  # (tm, Wp)

        mm_dtype = wb_ref.dtype  # feed the MXU in the weights' native dtype
        for d in range(depth):   # static unroll (depth is a compile-time const)
            u = jnp.tanh(
                jnp.dot(h.astype(mm_dtype), wb_ref[d],
                        preferred_element_type=jnp.float32)
                + bw_ref[d]).astype(vector_dtype)
            v = (jnp.dot(u.astype(mm_dtype), vb_ref[d],
                         preferred_element_type=jnp.float32) + bv_ref[d])  # f32
            h = jnp.tanh(h.astype(jnp.float32) + v).astype(vector_dtype)

        y = (jnp.dot(h.astype(wout_ref.dtype), wout_ref[...],
                     preferred_element_type=jnp.float32) + bout_ref[...])
        o_ref[...] = y.astype(o_ref.dtype)

    return kernel


def _vmem_capacity_bytes():
    try:
        cap = int(pltpu.get_tpu_info().vmem_capacity_bytes)
    except Exception:
        cap = 64 << 20          # conservative fallback (v7x per-TC size)
    return int(cap * 0.85)      # leave headroom for compiler internal scratch


def _pick_tile(batch, width_p, in_itemsize):
    # Sublane alignment follows dtype packing: f32 -> 8 rows, bf16 -> 16, 1B -> 32.
    align = {4: 8, 2: 16, 1: 32}.get(in_itemsize, 8)
    # Large tile cap amortizes the ~0.35us per-grid-step overhead; per-step
    # I/O is tiny (tm x 1 in, tm x out_p out) and the resident weights don't grow.
    if width_p <= 256:
        cap = 1024
    elif width_p <= 512:
        cap = 512
    else:
        cap = 256
    batch_a = _round_up(batch, align)
    # Force >=2 grid steps whenever the batch permits (v7x megacore sharding).
    half = _round_up(_cdiv(batch_a, 2), align)
    tm = max(align, min(cap, half))
    return tm, align


def time_forward(T, params, *, tm=None, vector_dtype=jnp.float32):
    """T: (batch, 1) or (batch,). Returns (batch, out) in T's dtype."""
    T = jnp.asarray(T)
    if T.ndim == 1:
        T = T[:, None]
    batch = T.shape[0]
    assert T.shape[1] == 1

    depth = params["depth"]
    width_p = params["width_p"]
    out_p = params["out_p"]

    in_itemsize = T.dtype.itemsize
    if tm is None:
        tm, align = _pick_tile(batch, width_p, in_itemsize)
    else:
        align = {4: 8, 2: 16, 1: 32}.get(in_itemsize, 8)
        tm = _round_up(tm, align)

    weight_arrays = (params["win"], params["bin"], params["wb"], params["bw"],
                     params["vb"], params["bv"], params["wout"], params["bout"])
    weight_bytes = sum(int(a.size) * a.dtype.itemsize for a in weight_arrays)

    def footprint(tile):
        io = 2 * tile * 1 * in_itemsize + 2 * tile * out_p * in_itemsize
        scratch = 6 * tile * width_p * 4          # f32 h/u/v + slack
        return weight_bytes + io + scratch

    vmem_cap = _vmem_capacity_bytes()
    # Shrink the tile if the estimated footprint would not fit the cap.
    while tm > align and footprint(tm) + (8 << 20) > vmem_cap:
        tm = max(align, _round_up(tm // 2, align))

    batch_p = _round_up(batch, tm)
    t_p = jnp.pad(T, ((0, batch_p - batch), (0, 0)))
    grid = (batch_p // tm,)

    # Constant-index (resident) operands -> single-buffered (keep: no dead
    # double-buffer VMEM, weights fetched once and stay resident).
    resident = dict(pipeline_mode=pl.Buffered(1))
    in_specs = [
        pl.BlockSpec((tm, 1), lambda i: (i, 0)),                                   # T tile
        pl.BlockSpec((1, width_p), lambda i: (0, 0), **resident),                  # W_in^T row
        pl.BlockSpec((1, width_p), lambda i: (0, 0), **resident),                  # b_in
        pl.BlockSpec((depth, width_p, width_p), lambda i: (0, 0, 0), **resident),  # W^T stack
        pl.BlockSpec((depth, 1, width_p), lambda i: (0, 0, 0), **resident),        # b_W stack
        pl.BlockSpec((depth, width_p, width_p), lambda i: (0, 0, 0), **resident),  # V^T stack
        pl.BlockSpec((depth, 1, width_p), lambda i: (0, 0, 0), **resident),        # b_V stack
        pl.BlockSpec((width_p, out_p), lambda i: (0, 0), **resident),              # W_out^T
        pl.BlockSpec((1, out_p), lambda i: (0, 0), **resident),                    # b_out
    ]
    out_specs = pl.BlockSpec((tm, out_p), lambda i: (i, 0))

    vmem_limit = int(min(vmem_cap, max(footprint(tm) + (8 << 20), 16 << 20)))

    flops = 2 * batch_p * width_p * (1 + 2 * depth * width_p + out_p)
    transcendentals = batch_p * width_p * (1 + 2 * depth)
    bytes_accessed = (weight_bytes
                      + batch_p * 1 * in_itemsize
                      + batch_p * out_p * in_itemsize)

    y_p = pl.pallas_call(
        _make_time_kernel(depth, vector_dtype=vector_dtype),
        out_shape=jax.ShapeDtypeStruct((batch_p, out_p), T.dtype),
        grid_spec=pltpu.PrefetchScalarGridSpec(
            num_scalar_prefetch=0,
            grid=grid,
            in_specs=in_specs,
            out_specs=out_specs,
        ),
        compiler_params=pltpu.CompilerParams(
            dimension_semantics=("parallel",),
            vmem_limit_bytes=vmem_limit,
        ),
        cost_estimate=pl.CostEstimate(
            flops=flops,
            transcendentals=transcendentals,
            bytes_accessed=bytes_accessed,
        ),
    )(t_p, params["win"], params["bin"], params["wb"], params["bw"],
      params["vb"], params["bv"], params["wout"], params["bout"])

    return y_p[:batch, :params["out"]]


# ---------------------------------------------------------------------------
# References.
#   _reference_f32      : exact PyTorch semantics in f32.
#   _reference_matched  : same compute graph as the kernel (bf16 matmul
#                         operands, f32 accumulation / bias / tanh) so the
#                         kernel itself is validated to tight tolerance.
# ---------------------------------------------------------------------------
def _reference_f32(T, w_in, b_in, block_params, w_out, b_out):
    h = jnp.tanh(T @ w_in.T + b_in)
    for (ww, wbias, vw, vbias) in block_params:
        u = jnp.tanh(h @ ww.T + wbias)
        h = jnp.tanh(h + (u @ vw.T + vbias))
    return h @ w_out.T + b_out


def _reference_matched(T, w_in, b_in, block_params, w_out, b_out, mm_dtype):
    def mm(a, b):
        return jnp.dot(a.astype(mm_dtype), b.astype(mm_dtype),
                       preferred_element_type=jnp.float32)
    h = jnp.tanh(T * w_in.T.astype(mm_dtype).astype(jnp.float32) + b_in)
    for (ww, wbias, vw, vbias) in block_params:
        u = jnp.tanh(mm(h, ww.T) + wbias)
        h = jnp.tanh(h + (mm(u, vw.T) + vbias))
    return mm(h, w_out.T) + b_out


if __name__ == "__main__":
    key = jax.random.PRNGKey(0)
    batch, width, depth, out = 64, 32, 3, 4

    def linear_init(k, out_f, in_f):
        kw, kb = jax.random.split(k)
        bound = 1.0 / math.sqrt(in_f)
        w = jax.random.uniform(kw, (out_f, in_f), jnp.float32, -bound, bound)
        b = jax.random.uniform(kb, (out_f,), jnp.float32, -bound, bound)
        return w, b

    keys = jax.random.split(key, depth + 3)
    k_t, k_in, k_out = keys[0], keys[1], keys[2]
    block_keys = keys[3:]

    w_in, b_in = linear_init(k_in, width, 1)          # nn.Linear(1, width)
    block_params = []
    for bk in block_keys:
        k1, k2 = jax.random.split(bk)
        ww, wbias = linear_init(k1, width, width)     # Block.W
        vw, vbias = linear_init(k2, width, width)     # Block.V
        block_params.append((ww, wbias, vw, vbias))
    w_out, b_out = linear_init(k_out, out, width)     # nn.Linear(width, out)

    T = jax.random.normal(k_t, (batch, 1), jnp.float32)

    params = prepare_time_params(w_in, b_in, block_params, w_out, b_out,
                                 param_dtype=jnp.bfloat16)
    y = time_forward(T, params)                       # vector math stays f32
    y = jax.block_until_ready(y)
    assert y.shape == (batch, out)

    # Tight check against a reference with the identical numeric recipe
    # (validates the kernel, independent of bf16 weight quantization).
    ref_m = _reference_matched(T, w_in, b_in, block_params, w_out, b_out,
                               jnp.bfloat16)
    err_m = float(jnp.max(jnp.abs(y - ref_m)))
    assert jnp.allclose(y, ref_m, atol=1e-4, rtol=1e-4), (
        f"mismatch vs matched-precision reference, max abs err = {err_m}")

    # Loose sanity check against the exact f32 PyTorch semantics (bounds the
    # bf16 weight-quantization error for this small network).
    ref_f = _reference_f32(T, w_in, b_in, block_params, w_out, b_out)
    err_f = float(jnp.max(jnp.abs(y - ref_f)))
    assert err_f < 0.2, f"bf16 weight quantization error too large: {err_f}"

    print("KERNEL_OK")
</pallas_src>

<mosaic_0001>
module attributes {stable_mosaic.version = 11 : i64} {
  func.func @kernel(%arg0: i32, %arg1: memref<32x1xf32, #tpu.memory_space<vmem>>, %arg2: memref<1x128xbf16, #tpu.memory_space<vmem>>, %arg3: memref<1x128xf32, #tpu.memory_space<vmem>>, %arg4: memref<3x128x128xbf16, #tpu.memory_space<vmem>>, %arg5: memref<3x1x128xf32, #tpu.memory_space<vmem>>, %arg6: memref<3x128x128xbf16, #tpu.memory_space<vmem>>, %arg7: memref<3x1x128xf32, #tpu.memory_space<vmem>>, %arg8: memref<128x128xbf16, #tpu.memory_space<vmem>>, %arg9: memref<1x128xf32, #tpu.memory_space<vmem>>, %arg10: memref<32x128xf32, #tpu.memory_space<vmem>>) attributes {dimension_semantics = [#tpu.dimension_semantics<parallel>], iteration_bounds = array<i64: 2>, scalar_prefetch = 0 : i64, scratch_operands = 0 : i64, tpu.core_type = #tpu.core_type<tc>, window_params = [{transform_indices = @transform_0, window_bounds = array<i64: 32, 1>}, {pipeline_mode = #tpu.pipeline_mode<synchronous>, transform_indices = @transform_1, window_bounds = array<i64: 1, 128>}, {pipeline_mode = #tpu.pipeline_mode<synchronous>, transform_indices = @transform_2, window_bounds = array<i64: 1, 128>}, {pipeline_mode = #tpu.pipeline_mode<synchronous>, transform_indices = @transform_3, window_bounds = array<i64: 3, 128, 128>}, {pipeline_mode = #tpu.pipeline_mode<synchronous>, transform_indices = @transform_4, window_bounds = array<i64: 3, 1, 128>}, {pipeline_mode = #tpu.pipeline_mode<synchronous>, transform_indices = @transform_5, window_bounds = array<i64: 3, 128, 128>}, {pipeline_mode = #tpu.pipeline_mode<synchronous>, transform_indices = @transform_6, window_bounds = array<i64: 3, 1, 128>}, {pipeline_mode = #tpu.pipeline_mode<synchronous>, transform_indices = @transform_7, window_bounds = array<i64: 128, 128>}, {pipeline_mode = #tpu.pipeline_mode<synchronous>, transform_indices = @transform_8, window_bounds = array<i64: 1, 128>}, {transform_indices = @transform_9, window_bounds = array<i64: 32, 128>}]} {
    %c0 = arith.constant 0 : index
    %c0_0 = arith.constant 0 : index
    %0 = vector.load %arg1[%c0, %c0_0] : memref<32x1xf32, #tpu.memory_space<vmem>>, vector<32x1xf32>
    %c0_1 = arith.constant 0 : index
    %c0_2 = arith.constant 0 : index
    %1 = vector.load %arg2[%c0_1, %c0_2] : memref<1x128xbf16, #tpu.memory_space<vmem>>, vector<1x128xbf16>
    %2 = arith.extf %1 : vector<1x128xbf16> to vector<1x128xf32>
    %3 = vector.broadcast %0 : vector<32x1xf32> to vector<32x128xf32>
    %4 = vector.broadcast %2 : vector<1x128xf32> to vector<32x128xf32>
    %5 = arith.mulf %3, %4 : vector<32x128xf32>
    %c0_3 = arith.constant 0 : index
    %c0_4 = arith.constant 0 : index
    %6 = vector.load %arg3[%c0_3, %c0_4] : memref<1x128xf32, #tpu.memory_space<vmem>>, vector<1x128xf32>
    %7 = vector.broadcast %6 : vector<1x128xf32> to vector<32x128xf32>
    %8 = arith.addf %5, %7 : vector<32x128xf32>
    %9 = math.tanh %8 : vector<32x128xf32>
    %10 = arith.truncf %9 : vector<32x128xf32> to vector<32x128xbf16>
    %c0_5 = arith.constant 0 : index
    %c0_6 = arith.constant 0 : index
    %c0_7 = arith.constant 0 : index
    %11 = vector.load %arg4[%c0_5, %c0_6, %c0_7] : memref<3x128x128xbf16, #tpu.memory_space<vmem>>, vector<1x128x128xbf16>
    %12 = vector.shape_cast %11 : vector<1x128x128xbf16> to vector<128x128xbf16>
    %cst = arith.constant dense<0.000000e+00> : vector<32x128xf32>
    %13 = tpu.matmul %10, %12, %cst {dimension_numbers = #tpu.dot_dimension_numbers<[1], [0], [0], [1], [0, 0, 1, 1], [], []>} : vector<32x128xbf16>, vector<128x128xbf16>, vector<32x128xf32> -> vector<32x128xf32>
    %c0_8 = arith.constant 0 : index
    %c0_9 = arith.constant 0 : index
    %c0_10 = arith.constant 0 : index
    %14 = vector.load %arg5[%c0_8, %c0_9, %c0_10] : memref<3x1x128xf32, #tpu.memory_space<vmem>>, vector<1x1x128xf32>
    %15 = vector.shape_cast %14 : vector<1x1x128xf32> to vector<1x128xf32>
    %16 = vector.broadcast %15 : vector<1x128xf32> to vector<32x128xf32>
    %17 = arith.addf %13, %16 : vector<32x128xf32>
    %18 = math.tanh %17 : vector<32x128xf32>
    %19 = arith.truncf %18 : vector<32x128xf32> to vector<32x128xbf16>
    %c0_11 = arith.constant 0 : index
    %c0_12 = arith.constant 0 : index
    %c0_13 = arith.constant 0 : index
    %20 = vector.load %arg6[%c0_11, %c0_12, %c0_13] : memref<3x128x128xbf16, #tpu.memory_space<vmem>>, vector<1x128x128xbf16>
    %21 = vector.shape_cast %20 : vector<1x128x128xbf16> to vector<128x128xbf16>
    %cst_14 = arith.constant dense<0.000000e+00> : vector<32x128xf32>
    %22 = tpu.matmul %19, %21, %cst_14 {dimension_numbers = #tpu.dot_dimension_numbers<[1], [0], [0], [1], [0, 0, 1, 1], [], []>} : vector<32x128xbf16>, vector<128x128xbf16>, vector<32x128xf32> -> vector<32x128xf32>
    %c0_15 = arith.constant 0 : index
    %c0_16 = arith.constant 0 : index
    %c0_17 = arith.constant 0 : index
    %23 = vector.load %arg7[%c0_15, %c0_16, %c0_17] : memref<3x1x128xf32, #tpu.memory_space<vmem>>, vector<1x1x128xf32>
    %24 = vector.shape_cast %23 : vector<1x1x128xf32> to vector<1x128xf32>
    %25 = vector.broadcast %24 : vector<1x128xf32> to vector<32x128xf32>
    %26 = arith.addf %22, %25 : vector<32x128xf32>
    %27 = arith.addf %9, %26 : vector<32x128xf32>
    %28 = math.tanh %27 : vector<32x128xf32>
    %29 = arith.truncf %28 : vector<32x128xf32> to vector<32x128xbf16>
    %c1 = arith.constant 1 : index
    %c0_18 = arith.constant 0 : index
    %c0_19 = arith.constant 0 : index
    %30 = vector.load %arg4[%c1, %c0_18, %c0_19] : memref<3x128x128xbf16, #tpu.memory_space<vmem>>, vector<1x128x128xbf16>
    %31 = vector.shape_cast %30 : vector<1x128x128xbf16> to vector<128x128xbf16>
    %cst_20 = arith.constant dense<0.000000e+00> : vector<32x128xf32>
    %32 = tpu.matmul %29, %31, %cst_20 {dimension_numbers = #tpu.dot_dimension_numbers<[1], [0], [0], [1], [0, 0, 1, 1], [], []>} : vector<32x128xbf16>, vector<128x128xbf16>, vector<32x128xf32> -> vector<32x128xf32>
    %c1_21 = arith.constant 1 : index
    %c0_22 = arith.constant 0 : index
    %c0_23 = arith.constant 0 : index
    %33 = vector.load %arg5[%c1_21, %c0_22, %c0_23] : memref<3x1x128xf32, #tpu.memory_space<vmem>>, vector<1x1x128xf32>
    %34 = vector.shape_cast %33 : vector<1x1x128xf32> to vector<1x128xf32>
    %35 = vector.broadcast %34 : vector<1x128xf32> to vector<32x128xf32>
    %36 = arith.addf %32, %35 : vector<32x128xf32>
    %37 = math.tanh %36 : vector<32x128xf32>
    %38 = arith.truncf %37 : vector<32x128xf32> to vector<32x128xbf16>
    %c1_24 = arith.constant 1 : index
    %c0_25 = arith.constant 0 : index
    %c0_26 = arith.constant 0 : index
    %39 = vector.load %arg6[%c1_24, %c0_25, %c0_26] : memref<3x128x128xbf16, #tpu.memory_space<vmem>>, vector<1x128x128xbf16>
    %40 = vector.shape_cast %39 : vector<1x128x128xbf16> to vector<128x128xbf16>
    %cst_27 = arith.constant dense<0.000000e+00> : vector<32x128xf32>
    %41 = tpu.matmul %38, %40, %cst_27 {dimension_numbers = #tpu.dot_dimension_numbers<[1], [0], [0], [1], [0, 0, 1, 1], [], []>} : vector<32x128xbf16>, vector<128x128xbf16>, vector<32x128xf32> -> vector<32x128xf32>
    %c1_28 = arith.constant 1 : index
    %c0_29 = arith.constant 0 : index
    %c0_30 = arith.constant 0 : index
    %42 = vector.load %arg7[%c1_28, %c0_29, %c0_30] : memref<3x1x128xf32, #tpu.memory_space<vmem>>, vector<1x1x128xf32>
    %43 = vector.shape_cast %42 : vector<1x1x128xf32> to vector<1x128xf32>
    %44 = vector.broadcast %43 : vector<1x128xf32> to vector<32x128xf32>
    %45 = arith.addf %41, %44 : vector<32x128xf32>
    %46 = arith.addf %28, %45 : vector<32x128xf32>
    %47 = math.tanh %46 : vector<32x128xf32>
    %48 = arith.truncf %47 : vector<32x128xf32> to vector<32x128xbf16>
    %c2 = arith.constant 2 : index
    %c0_31 = arith.constant 0 : index
    %c0_32 = arith.constant 0 : index
    %49 = vector.load %arg4[%c2, %c0_31, %c0_32] : memref<3x128x128xbf16, #tpu.memory_space<vmem>>, vector<1x128x128xbf16>
    %50 = vector.shape_cast %49 : vector<1x128x128xbf16> to vector<128x128xbf16>
    %cst_33 = arith.constant dense<0.000000e+00> : vector<32x128xf32>
    %51 = tpu.matmul %48, %50, %cst_33 {dimension_numbers = #tpu.dot_dimension_numbers<[1], [0], [0], [1], [0, 0, 1, 1], [], []>} : vector<32x128xbf16>, vector<128x128xbf16>, vector<32x128xf32> -> vector<32x128xf32>
    %c2_34 = arith.constant 2 : index
    %c0_35 = arith.constant 0 : index
    %c0_36 = arith.constant 0 : index
    %52 = vector.load %arg5[%c2_34, %c0_35, %c0_36] : memref<3x1x128xf32, #tpu.memory_space<vmem>>, vector<1x1x128xf32>
    %53 = vector.shape_cast %52 : vector<1x1x128xf32> to vector<1x128xf32>
    %54 = vector.broadcast %53 : vector<1x128xf32> to vector<32x128xf32>
    %55 = arith.addf %51, %54 : vector<32x128xf32>
    %56 = math.tanh %55 : vector<32x128xf32>
    %57 = arith.truncf %56 : vector<32x128xf32> to vector<32x128xbf16>
    %c2_37 = arith.constant 2 : index
    %c0_38 = arith.constant 0 : index
    %c0_39 = arith.constant 0 : index
    %58 = vector.load %arg6[%c2_37, %c0_38, %c0_39] : memref<3x128x128xbf16, #tpu.memory_space<vmem>>, vector<1x128x128xbf16>
    %59 = vector.shape_cast %58 : vector<1x128x128xbf16> to vector<128x128xbf16>
    %cst_40 = arith.constant dense<0.000000e+00> : vector<32x128xf32>
    %60 = tpu.matmul %57, %59, %cst_40 {dimension_numbers = #tpu.dot_dimension_numbers<[1], [0], [0], [1], [0, 0, 1, 1], [], []>} : vector<32x128xbf16>, vector<128x128xbf16>, vector<32x128xf32> -> vector<32x128xf32>
    %c2_41 = arith.constant 2 : index
    %c0_42 = arith.constant 0 : index
    %c0_43 = arith.constant 0 : index
    %61 = vector.load %arg7[%c2_41, %c0_42, %c0_43] : memref<3x1x128xf32, #tpu.memory_space<vmem>>, vector<1x1x128xf32>
    %62 = vector.shape_cast %61 : vector<1x1x128xf32> to vector<1x128xf32>
    %63 = vector.broadcast %62 : vector<1x128xf32> to vector<32x128xf32>
    %64 = arith.addf %60, %63 : vector<32x128xf32>
    %65 = arith.addf %47, %64 : vector<32x128xf32>
    %66 = math.tanh %65 : vector<32x128xf32>
    %67 = arith.truncf %66 : vector<32x128xf32> to vector<32x128xbf16>
    %c0_44 = arith.constant 0 : index
    %c0_45 = arith.constant 0 : index
    %68 = vector.load %arg8[%c0_44, %c0_45] : memref<128x128xbf16, #tpu.memory_space<vmem>>, vector<128x128xbf16>
    %cst_46 = arith.constant dense<0.000000e+00> : vector<32x128xf32>
    %69 = tpu.matmul %67, %68, %cst_46 {dimension_numbers = #tpu.dot_dimension_numbers<[1], [0], [0], [1], [0, 0, 1, 1], [], []>} : vector<32x128xbf16>, vector<128x128xbf16>, vector<32x128xf32> -> vector<32x128xf32>
    %c0_47 = arith.constant 0 : index
    %c0_48 = arith.constant 0 : index
    %70 = vector.load %arg9[%c0_47, %c0_48] : memref<1x128xf32, #tpu.memory_space<vmem>>, vector<1x128xf32>
    %71 = vector.broadcast %70 : vector<1x128xf32> to vector<32x128xf32>
    %72 = arith.addf %69, %71 : vector<32x128xf32>
    %c0_49 = arith.constant 0 : index
    %c0_50 = arith.constant 0 : index
    %73 = vector.load %arg10[%c0_49, %c0_50] : memref<32x128xf32, #tpu.memory_space<vmem>>, vector<32x128xf32>
    tpu.vector_store %arg10[%c0_49, %c0_50], %72 {strides = array<i32>} : memref<32x128xf32, #tpu.memory_space<vmem>>, vector<32x128xf32>,
    return
  }
  func.func @transform_0(%arg0: i32) -> (i32, i32) {
    %c0_i32 = arith.constant 0 : i32
    %c0_i32_0 = arith.constant 0 : i32
    return %arg0, %c0_i32 : i32, i32
  }
  func.func @transform_1(%arg0: i32) -> (i32, i32) {
    %c0_i32 = arith.constant 0 : i32
    %c0_i32_0 = arith.constant 0 : i32
    %c0_i32_1 = arith.constant 0 : i32
    return %c0_i32, %c0_i32_0 : i32, i32
  }
  func.func @transform_2(%arg0: i32) -> (i32, i32) {
    %c0_i32 = arith.constant 0 : i32
    %c0_i32_0 = arith.constant 0 : i32
    %c0_i32_1 = arith.constant 0 : i32
    return %c0_i32, %c0_i32_0 : i32, i32
  }
  func.func @transform_3(%arg0: i32) -> (i32, i32, i32) {
    %c0_i32 = arith.constant 0 : i32
    %c0_i32_0 = arith.constant 0 : i32
    %c0_i32_1 = arith.constant 0 : i32
    %c0_i32_2 = arith.constant 0 : i32
    return %c0_i32, %c0_i32_0, %c0_i32_1 : i32, i32, i32
  }
  func.func @transform_4(%arg0: i32) -> (i32, i32, i32) {
    %c0_i32 = arith.constant 0 : i32
    %c0_i32_0 = arith.constant 0 : i32
    %c0_i32_1 = arith.constant 0 : i32
    %c0_i32_2 = arith.constant 0 : i32
    return %c0_i32, %c0_i32_0, %c0_i32_1 : i32, i32, i32
  }
  func.func @transform_5(%arg0: i32) -> (i32, i32, i32) {
    %c0_i32 = arith.constant 0 : i32
    %c0_i32_0 = arith.constant 0 : i32
    %c0_i32_1 = arith.constant 0 : i32
    %c0_i32_2 = arith.constant 0 : i32
    return %c0_i32, %c0_i32_0, %c0_i32_1 : i32, i32, i32
  }
  func.func @transform_6(%arg0: i32) -> (i32, i32, i32) {
    %c0_i32 = arith.constant 0 : i32
    %c0_i32_0 = arith.constant 0 : i32
    %c0_i32_1 = arith.constant 0 : i32
    %c0_i32_2 = arith.constant 0 : i32
    return %c0_i32, %c0_i32_0, %c0_i32_1 : i32, i32, i32
  }
  func.func @transform_7(%arg0: i32) -> (i32, i32) {
    %c0_i32 = arith.constant 0 : i32
    %c0_i32_0 = arith.constant 0 : i32
    %c0_i32_1 = arith.constant 0 : i32
    return %c0_i32, %c0_i32_0 : i32, i32
  }
  func.func @transform_8(%arg0: i32) -> (i32, i32) {
    %c0_i32 = arith.constant 0 : i32
    %c0_i32_0 = arith.constant 0 : i32
    %c0_i32_1 = arith.constant 0 : i32
    return %c0_i32, %c0_i32_0 : i32, i32
  }
  func.func @transform_9(%arg0: i32) -> (i32, i32) {
    %c0_i32 = arith.constant 0 : i32
    %c0_i32_0 = arith.constant 0 : i32
    return %arg0, %c0_i32 : i32, i32
  }
}

</mosaic_0001>

<bundles_post_ra>
// kernel: tpu_custom_call.1
= control target key start
LH: loop header
LB: loop body
LE: loop exit
PB: predicated region body
PF: predicated region fallthrough
CT: control target
= control target key end

     0   :  { %s2095_s0 = inlined_call_operand.vmem [shape: f32[64,1], index: 0, kind: input, shape index: {}]   ;;  %s2096_s1 = inlined_call_operand.vmem [shape: bf16[1,128], index: 1, kind: input, shape index: {}]   ;;  %s2097_s2 = inlined_call_operand.hbm [shape: f32[1,128], index: 2, kind: input, shape index: {}]   ;;  %s2098_s3 = inlined_call_operand.hbm [shape: bf16[3,128,128], index: 3, kind: input, shape index: {}]   ;;  %s2099_s4 = inlined_call_operand.vmem [shape: f32[3,1,128], index: 4, kind: input, shape index: {}]   ;;  %s2100_s5 = inlined_call_operand.hbm [shape: bf16[3,128,128], index: 5, kind: input, shape index: {}]   ;;  %s2101_s6 = inlined_call_operand.vmem [shape: f32[3,1,128], index: 6, kind: input, shape index: {}]   ;;  %s2102_s7 = inlined_call_operand.vmem [shape: bf16[128,128], index: 7, kind: input, shape index: {}]   ;;  %s2103_s8 = inlined_call_operand.vmem [shape: f32[1,128], index: 8, kind: input, shape index: {}]   ;;  %s2104_s9 = inlined_call_operand.hbm [shape: f32[64,128], index: 9, kind: output, shape index: {}]  }
   0x1   :  { %2105 = sst [smem:[#allocation13_spill]] %s2098_s3 }
   0x2   :  { %14 = vsyncpa [#allocation3], 0 }
   0x3   :  { %15 = vsyncpa [#allocation6], 0 }
   0x4   :  { %16 = vsyncpa [#allocation4], 0 }
   0x5   :  { %18 = vsyncpa [#allocation4 + $0x1], 0  ;;  %s1877_s30 = smov 0   ;;  %s1879_s10 = smov 0  }
   0x6   :  { %s1881_s11 = smov 0   ;;  %s1883_s12 = smov 0  }
   0x7 LB: > { %s1898_s13 = sadd.s32 4294967295, %s1817_s12   ;;  %s1205_s14 = sadd.s32 4294967294, %s1817_s12   ;;  %s1817_s12 = sphi %s1883_s12, %s2116_s12   ;;  %s1813_s11 = sphi %s1881_s11, %s2115_s11   ;;  %s1809_s10 = sphi %s1879_s10, %s2114_s10   ;;  %s1805_s30 = sphi %s1877_s30, %s2113_s30  }
   0x8   : > { %s1902_s15 = sadd.s32 1, %s1817_s12   ;;  %s225_s16 = sadd.s32 1, %s1813_s11 }
   0x9   : > { %s222_s17 = ssub.s32 %s1817_s12, %s1902_s15  ;;  %p235_p0 = scmp.ne.s32.totalorder %s1813_s11, %s1809_s10 }
   0xa   : > { %p223_p1 = scmp.eq.s32.totalorder %s222_s17, 0  ;;  %p236_p2 = scmp.eq.s32.totalorder %s1898_s13, 1 }
   0xb   : > { %p241_p3 = scmp.ne.s32.totalorder %s1809_s10, %s1805_s30  ;;  %p242_p4 = scmp.eq.s32.totalorder %s1205_s14, 1 }
   0xc   : > { %s1913_s18 = scalar_select %p223_p1, %s1813_s11, %s225_s16  }
   0xd   : > { %p1915_p5 = por %p236_p2, %p235_p0  ;;  %p1919_p6 = por %p242_p4, %p241_p3 }
   0xe   : > { %2106 = sst [smem:[#allocation12_spill]] %s1913_s18  ;;  %p1206_p7 = scmp.ge.s32.totalorder %s1817_s12, 1 }
   0xf   : > { %p249_p8 = scmp.lt.s32.totalorder %s1817_s12, 3  ;;  %p1544_p9 = scmp.eq.s32.totalorder %s1898_s13, 0 }
  0x10   : > { %s2110_s3 = sld [smem:[#allocation13_spill]]  ;;  %s1819_s25 = smov [#allocation5]  }
  0x11   : > { %p1926_p10 = pnand %p1206_p7, %p249_p8  ;;  %s277_s26 = sshll.u32 %s1819_s25, 4  ;;  %s278_s26 = int_to_ptr.vmem [resolvable:$true] %s277_s26 }
  0x12   : > { %s264_s14 = sshll.u32 %s2097_s2, 4  ;;  %s1820_s16 = smov 64   ;;  %s265_s14 = int_to_ptr.hbm [resolvable:$true] %s264_s14 }
  0x13   : > { %p1530_p11 = pneg %p1926_p10  ;;  %s1821_s17 = smov 4  }
  0x14   : > { %s1822_s22 = smov [#allocation2]   ;;  %s292_s18 = sshll.u32 %s2100_s5, 4  ;;  %s293_s18 = int_to_ptr.hbm [resolvable:$true] %s292_s18 }
  0x15   : > { %p1937_p12 = pnand %p1544_p9, %p1530_p11  ;;  %s266_s23 = sshll.u32 %s1822_s22, 4  ;;  %s267_s23 = int_to_ptr.vmem [resolvable:$true] %s266_s23 }
  0x16   : > { %s275_s24 = sshll.u32 %s2110_s3, 4  ;;  %s1823_s28 = smov [#allocation7]   ;;  %s276_s24 = int_to_ptr.hbm [resolvable:$true] %s275_s24 }
  0x17   : > { %1536 = dma.hbm_to_vmem [thread:$0]  (!%p1937_p12), %s276_s24, 3072, %s278_s26, [#allocation6], %s1820_s16, %s1820_s16, %s1821_s17  }
  0x18   : > { %1533 = dma.hbm_to_vmem [thread:$0]  (!%p1937_p12), %s265_s14, 16, %s267_s23, [#allocation3]  }
  0x19   : > { %s294_s29 = sshll.u32 %s1823_s28, 4  ;;  %328 = sbr.rel (%p1926_p10) target bundleno = 1232 (0x4d0), region = 56  ;;  %s295_s29 = int_to_ptr.vmem [resolvable:$true] %s294_s29 }
  0x1a   : > { %1539 = dma.hbm_to_vmem [thread:$0]  (!%p1937_p12), %s293_s18, 3072, %s295_s29, [#allocation6], %s1820_s16, %s1820_s16, %s1821_s17  }
  0x1e   : > { %1792 = dma.done.wait (%p1544_p9), [#allocation3], 16  }
  0x1f   : > { %1794 = vsyncadd (%p1544_p9), [#allocation3], 4294967280 }
  0x20   : > { %1796 = dma.done.wait (%p1544_p9), [#allocation6], 6144  }
  0x21   : > { %1798 = vsyncadd (%p1544_p9), [#allocation6], 4294961152  ;;  %s1216_s3 = sshll.u32 %s1898_s13, 2  ;;  %v1824_v0 = vmov 0   ;;  %v1458_v3 = vld [vmem:[#allocation5 + $0x38] sm:$0xff]  ;;  %v1457_v4 = vld [vmem:[#allocation5 + $0x30] sm:$0xff] }
  0x22   : > { %1591 = vset.pattern.permute.xlu0 %v1824_v0  ;;  %p376_p13 = scmp.lt.s32.totalorder %s1216_s3, 7  ;;  %1592 = vset.pattern.permute.xlu1 %v1824_v0  ;;  %v1456_v7 = vld [vmem:[#allocation5 + $0x28] sm:$0xff]  ;;  %v1455_v8 = vld [vmem:[#allocation5 + $0x20] sm:$0xff]  ;;  %v1454_v9 = vld [vmem:[#allocation5 + $0x18] sm:$0xff]  ;;  %s372_s16 = sand.u32 1, %s1809_s10  }
  0x23   : > { %495 = vmatpush.bf16.msra.mxu0 %v1458_v3  ;;  %v1453_v10 = vld [vmem:[#allocation5 + $0x10] sm:$0xff]  ;;  %v1452_v11 = vld [vmem:[#allocation5 + $0x8] sm:$0xff]  ;;  %v1451_v12 = vld [vmem:[#allocation5] sm:$0xff]  ;;  %s1215_s17 = sshll.u32 %s372_s16, 5  ;;  %s1507_s28 = sshll.u32 %s1898_s13, 5 }
  0x24   : > { %s2118_s3 = smov (!%p376_p13, %s1216_s3), 7  ;;  %v386_v13 = vld [vmem:[%s2096_s1] sm:$0x1]  ;;  %v1593_v17 = vld [vmem:[#allocation2] ss:$0 sm:$0xff]  ;;  %v1464_v26 = vld [vmem:[#allocation7 + $0x28] sm:$0xff] }
  0x25   : > { %s1217_s18 = sshll.u32 %s2118_s3, 3  ;;  %v387_v14 = vunpack.c.l.bf16 %v386_v13  ;;  %v1466_v20 = vld [vmem:[#allocation7 + $0x38] sm:$0xff]  ;;  %v1465_v23 = vld [vmem:[#allocation7 + $0x30] sm:$0xff]  ;;  %v1463_v38 = vld [vmem:[#allocation7 + $0x20] sm:$0xff]  ;;  %s374_s25 = scalar_lea.vmem [#allocation8], %s1215_s17 }
  0x26   : > { %s379_s26 = scalar_lea.vmem %s2095_s0, %s1217_s18  ;;  %588 = vmatpush.bf16.msra.mxu1 %v1466_v20  ;;  %v1462_v39 = vld [vmem:[#allocation7 + $0x18] sm:$0xff]  ;;  %v1461_v40 = vld [vmem:[#allocation7 + $0x10] sm:$0xff]  ;;  %v1460_v41 = vld [vmem:[#allocation7 + $0x8] sm:$0xff]  ;;  %s1108_s18 = scalar_lea.hbm %s2104_s9, %s1507_s28 }
  0x27   : > { %v382_v1 = vld [vmem:[%s379_s26] sm:$0xff]  ;;  %v384_v2 = vld [vmem:[%s379_s26 + $0x10] sm:$0xff]  ;;  %v383_v5 = vld [vmem:[%s379_s26 + $0x8] sm:$0xff]  ;;  %496 = vmatpush.bf16.msra.mxu0 %v1457_v4  ;;  %v408_v15 = vperm.slane %v387_v14, 0  ;;  %s1109_s21 = sshll.u32 %s374_s25, 4  ;;  %s1111_s24 = sshll.u32 %s1108_s18, 4  ;;  %s1110_s21 = int_to_ptr.vmem [resolvable:$true] %s1109_s21  ;;  %s1112_s24 = int_to_ptr.hbm [resolvable:$true] %s1111_s24 }
  0x28   : > { %390 = vperm.xlu0 %1591, %v382_v1   ;;  %400 = vperm.xlu1 %1592, %v384_v2   ;;  %v385_v6 = vld [vmem:[%s379_s26 + $0x18] sm:$0xff]  ;;  %v1459_v42 = vld [vmem:[#allocation7] sm:$0xff]  ;;  %v1594_v44 = vld [vmem:[%s2099_s4] ss:$0 sm:$0xff]  ;;  %s1097_s26 = scalar_lea.sflag [#allocation4], %s372_s16  ;;  %s1761_s27 = sshra.s32 %s1112_s24, 4  ;;  %s1762_s27 = int_to_ptr.hbm [resolvable:$true] %s1761_s27 }
  0x29   : > { %v1474_v45 = vld [vmem:[#allocation5 + $0x78] sm:$0xff]  ;;  %v1473_v47 = vld [vmem:[#allocation5 + $0x70] sm:$0xff]  ;;  %v1472_v50 = vld [vmem:[#allocation5 + $0x68] sm:$0xff]  ;;  %s1763_s14 = scalar_lea.hbm %s1762_s27, 32  ;;  %s1767_s22 = scalar_lea.hbm %s2104_s9, 64 }
  0x2a   : > { %589 = vmatpush.bf16.msra.mxu1 %v1465_v23  ;;  %687 = vmatpush.bf16.msra.mxu2 %v1474_v45  ;;  %v1471_v61 = vld [vmem:[#allocation5 + $0x60] sm:$0xff]  ;;  %v1470_v62 = vld [vmem:[#allocation5 + $0x58] sm:$0xff]  ;;  %v1469_v63 = vld [vmem:[#allocation5 + $0x50] sm:$0xff]  ;;  %p1764_p0 = scmp.ne.s32.totalorder %s1762_s27, %s1763_s14  ;;  %p1768_p3 = scmp.lt.s32.totalorder %s1762_s27, %s2104_s9 }
  0x2b   : > { %497 = vmatpush.bf16.msra.mxu0 %v1456_v7  ;;  %v1468_v0 = vld [vmem:[#allocation5 + $0x48] sm:$0xff]  ;;  %v1467_v1 = vld [vmem:[#allocation5 + $0x40] sm:$0xff]  ;;  %v1595_v2 = vld [vmem:[%s2101_s6] ss:$0 sm:$0xff]  ;;  %p1769_p4 = scmp.lt.s32.totalorder %s1767_s22, %s1763_s14 }
  0x2c   : > { %p1765_p1 = pnand %p1764_p0, %p1915_p5 }
  0x2d   : > { %p1770_p7 = por %p1769_p4, %p1768_p3 }
  0x2e   : > { %590 = vmatpush.bf16.msra.mxu1 %v1464_v26  ;;  %688 = vmatpush.bf16.msra.mxu2 %v1473_v47  ;;  %v1477_v26 = vld [vmem:[#allocation7 + $0x50] sm:$0xff]  ;;  %v1487_v47 = vld [vmem:[#allocation5 + $0xa0] sm:$0xff]  ;;  %p1766_p2 = pneg %p1765_p1 }
  0x2f   : > { %498 = vmatpush.bf16.msra.mxu0 %v1455_v8  ;;  %v1481_v8 = vld [vmem:[#allocation7 + $0x70] sm:$0xff] }
  0x30   : > { %395 = vperm.xlu0 %1591, %v383_v5   ;;  %405 = vperm.xlu1 %1592, %v385_v6   ;;  %v1482_v5 = vld [vmem:[#allocation7 + $0x78] sm:$0xff]  ;;  %p1771_p8 = pnand %p1770_p7, %p1766_p2 }
  0x31   : > { %782 = vmatpush.bf16.msra.mxu3 %v1482_v5 }
  0x32   : > { %591 = vmatpush.bf16.msra.mxu1 %v1463_v38  ;;  %689 = vmatpush.bf16.msra.mxu2 %v1472_v50  ;;  %v1484_v50 = vld [vmem:[#allocation5 + $0x88] sm:$0xff] }
  0x33   : > { %499 = vmatpush.bf16.msra.mxu0 %v1454_v9 }
  0x35   : > { %783 = vmatpush.bf16.msra.mxu3 %v1481_v8 }
  0x36   : > { %592 = vmatpush.bf16.msra.mxu1 %v1462_v39  ;;  %690 = vmatpush.bf16.msra.mxu2 %v1471_v61  ;;  %v1496_v61 = vld [vmem:[#allocation7 + $0xa8] sm:$0xff] }
  0x37   : > { %500 = vmatpush.bf16.msra.mxu0 %v1453_v10 }
  0x3a   : > { %593 = vmatpush.bf16.msra.mxu1 %v1461_v40  ;;  %691 = vmatpush.bf16.msra.mxu2 %v1470_v62 }
  0x3b   : > { %501 = vmatpush.bf16.msra.mxu0 %v1452_v11  ;;  %v1480_v11 = vld [vmem:[#allocation7 + $0x68] sm:$0xff] }
  0x3c   : > { %784 = vmatpush.bf16.msra.mxu3 %v1480_v11  ;;  %v1494_v11 = vld [vmem:[#allocation7 + $0x98] sm:$0xff] }
  0x3e   : > { %594 = vmatpush.bf16.msra.mxu1 %v1460_v41  ;;  %692 = vmatpush.bf16.msra.mxu2 %v1469_v63 }
  0x3f   : > { %502 = vmatpush.bf16.msra.mxu0 %v1451_v12 }
  0x42   : > { %595 = vmatpush.bf16.msra.mxu1 %v1459_v42  ;;  %693 = vmatpush.bf16.msra.mxu2 %v1468_v0 }
  0x46   : > { %694 = vmatpush.bf16.msra.mxu2 %v1467_v1 }
  0x9a   : > { %v391_v16 = vpop.permute.xlu0 %390  ;;  %v401_v19 = vpop.permute.xlu1 %400 }
  0x9b   : > { %v409_v18 = vmul.f32 %v408_v15, %v391_v16  ;;  %v411_v29 = vmul.f32 %v408_v15, %v401_v19 }
  0x9d   : > { %v417_v21 = vadd.f32 %v1593_v17, %v409_v18  ;;  %v419_v33 = vadd.f32 %v1593_v17, %v411_v29 }
  0x9f   : > { %1601 = vtanh.f32 %v417_v21 }
  0xa2   : > { %v396_v22 = vpop.permute.xlu0 %395  ;;  %v406_v27 = vpop.permute.xlu1 %405 }
  0xa3   : > { %v410_v24 = vmul.f32 %v408_v15, %v396_v22  ;;  %v412_v31 = vmul.f32 %v408_v15, %v406_v27  ;;  %v1476_v27 = vld [vmem:[#allocation7 + $0x48] sm:$0xff] }
  0xa5   : > { %v418_v25 = vadd.f32 %v1593_v17, %v410_v24  ;;  %v1970_v28 = vpop.eup %1601  ;;  %v420_v34 = vadd.f32 %v1593_v17, %v412_v31  ;;  %v1479_v24 = vld [vmem:[#allocation7 + $0x60] sm:$0xff]  ;;  %v1490_v31 = vld [vmem:[#allocation5 + $0xb8] sm:$0xff] }
  0xa6   : > { %785 = vmatpush.bf16.msra.mxu3 %v1479_v24  ;;  %881 = vmatpush.bf16.msrb.mxu0 %v1490_v31 }
  0xa7   : > { %1603 = vtanh.f32 %v418_v25  ;;  %v1478_v25 = vld [vmem:[#allocation7 + $0x58] sm:$0xff] }
  0xa8   : > { %1605 = vtanh.f32 %v419_v33  ;;  %v1489_v33 = vld [vmem:[#allocation5 + $0xb0] sm:$0xff] }
  0xa9   : > { %1607 = vtanh.f32 %v420_v34 }
  0xaa   : > { %786 = vmatpush.bf16.msra.mxu3 %v1478_v25  ;;  %882 = vmatpush.bf16.msrb.mxu0 %v1489_v33 }
  0xad   : > { %v1972_v30 = vpop.eup %1603 }
  0xae   : > { %v425_v32 = vpack.c.bf16 %v1972_v30, %v1970_v28  ;;  %v1976_v35 = vpop.eup %1605  ;;  %787 = vmatpush.bf16.msra.mxu3 %v1477_v26 }
  0xaf   : > { %v1978_v36 = vpop.eup %1607 }
  0xb0   : > { %503 = vmatmul.bf16.vlgmr.msra.gmra.mxu0 %v425_v32  ;;  %v426_v37 = vpack.c.bf16 %v1978_v36, %v1976_v35 }
  0xb2   : > { %788 = vmatpush.bf16.msra.mxu3 %v1476_v27 }
  0xc0   : > { %508 = vmatmul.bf16.gmra.mxu0 %v426_v37 }
 0x12d   : > { %v504_v43 = vpop.f32.mrf.mxu0 }
 0x12e   : > { %v505_v46 = vadd.f32 %v1594_v44, %v504_v43 }
 0x130   : > { %1609 = vtanh.f32 %v505_v46 }
 0x135   : > { %v506_v48 = vpop.f32.mrf.mxu0 }
 0x136   : > { %v507_v49 = vadd.f32 %v1594_v44, %v506_v48  ;;  %v1610_v51 = vpop.eup %1609  ;;  %v1486_v48 = vld [vmem:[#allocation5 + $0x98] sm:$0xff] }
 0x138   : > { %1611 = vtanh.f32 %v507_v49  ;;  %v1485_v49 = vld [vmem:[#allocation5 + $0x90] sm:$0xff] }
 0x13d   : > { %v509_v52 = vpop.f32.mrf.mxu0 }
 0x13e   : > { %v1612_v53 = vpop.eup %1611  ;;  %v510_v55 = vadd.f32 %v1594_v44, %v509_v52  ;;  %v1597_v52 = vld [vmem:[%s2101_s6 + $0x1] ss:$0 sm:$0xff] }
 0x13f   : > { %v518_v54 = vpack.c.bf16 %v1612_v53, %v1610_v51  ;;  %v1483_v51 = vld [vmem:[#allocation5 + $0x80] sm:$0xff] }
 0x140   : > { %1613 = vtanh.f32 %v510_v55  ;;  %v1498_v55 = vld [vmem:[#allocation7 + $0xb8] sm:$0xff] }
 0x141   : > { %596 = vmatmul.bf16.vlgmr.msra.gmra.mxu1 %v518_v54 }
 0x142   : > { %976 = vmatpush.bf16.msrb.mxu1 %v1498_v55 }
 0x145   : > { %v511_v56 = vpop.f32.mrf.mxu0 }
 0x146   : > { %v512_v57 = vadd.f32 %v1594_v44, %v511_v56  ;;  %v1614_v58 = vpop.eup %1613 }
 0x148   : > { %1615 = vtanh.f32 %v512_v57 }
 0x14e   : > { %v1616_v59 = vpop.eup %1615 }
 0x14f   : > { %v519_v60 = vpack.c.bf16 %v1616_v59, %v1614_v58  ;;  %v1497_v58 = vld [vmem:[#allocation7 + $0xb0] sm:$0xff] }
 0x150   : > { %977 = vmatpush.bf16.msrb.mxu1 %v1497_v58 }
 0x151   : > { %601 = vmatmul.bf16.gmra.mxu1 %v519_v60 }
 0x154   : > { %978 = vmatpush.bf16.msrb.mxu1 %v1496_v61 }
 0x1be   : > { %v597_v3 = vpop.f32.mrf.mxu1 }
 0x1bf   : > { %v598_v4 = vadd.f32 %v1595_v2, %v597_v3 }
 0x1c1   : > { %v607_v6 = vadd.f32 %v1970_v28, %v598_v4  ;;  %v1475_v28 = vld [vmem:[#allocation7 + $0x40] sm:$0xff] }
 0x1c2   : > { %789 = vmatpush.bf16.msra.mxu3 %v1475_v28 }
 0x1c3   : > { %1617 = vtanh.f32 %v607_v6 }
 0x1c6   : > { %v599_v7 = vpop.f32.mrf.mxu1  ;;  %1508 = vmatpush.bf16.msrb.mxu3 %v1490_v31 }
 0x1c7   : > { %v600_v9 = vadd.f32 %v1595_v2, %v599_v7 }
 0x1c9   : > { %v608_v10 = vadd.f32 %v1972_v30, %v600_v9  ;;  %v1990_v13 = vpop.eup %1617  ;;  %v1596_v30 = vld [vmem:[%s2099_s4 + $0x1] ss:$0 sm:$0xff] }
 0x1ca   : > { %1509 = vmatpush.bf16.msrb.mxu3 %v1489_v33  ;;  %v1503_v33 = vld [vmem:[%s2102_s7 + $0x20] sm:$0xff] }
 0x1cb   : > { %1619 = vtanh.f32 %v608_v10  ;;  %v1495_v10 = vld [vmem:[#allocation7 + $0xa0] sm:$0xff] }
 0x1cc   : > { %979 = vmatpush.bf16.msrb.mxu1 %v1495_v10 }
 0x1ce   : > { %v602_v12 = vpop.f32.mrf.mxu1 }
 0x1cf   : > { %v603_v15 = vadd.f32 %v1595_v2, %v602_v12  ;;  %v1493_v12 = vld [vmem:[#allocation7 + $0x90] sm:$0xff] }
 0x1d0   : > { %980 = vmatpush.bf16.msrb.mxu1 %v1494_v11 }
 0x1d1   : > { %v1992_v14 = vpop.eup %1619  ;;  %v609_v17 = vadd.f32 %v1976_v35, %v603_v15 }
 0x1d2   : > { %v615_v16 = vpack.c.bf16 %v1992_v14, %v1990_v13 }
 0x1d3   : > { %1621 = vtanh.f32 %v609_v17 }
 0x1d4   : > { %695 = vmatmul.bf16.vlgmr.msra.gmra.mxu2 %v615_v16  ;;  %981 = vmatpush.bf16.msrb.mxu1 %v1493_v12  ;;  %v1598_v16 = vld [vmem:[%s2099_s4 + $0x2] ss:$0 sm:$0xff] }
 0x1d6   : > { %v604_v18 = vpop.f32.mrf.mxu1 }
 0x1d7   : > { %v605_v19 = vadd.f32 %v1595_v2, %v604_v18 }
 0x1d9   : > { %v610_v20 = vadd.f32 %v1978_v36, %v605_v19  ;;  %v1998_v21 = vpop.eup %1621  ;;  %v1488_v36 = vld [vmem:[#allocation5 + $0xa8] sm:$0xff] }
 0x1da   : > { %883 = vmatpush.bf16.msrb.mxu0 %v1488_v36  ;;  %1510 = vmatpush.bf16.msrb.mxu3 %v1488_v36  ;;  %v1500_v36 = vld [vmem:[%s2102_s7 + $0x8] sm:$0xff] }
 0x1db   : > { %1623 = vtanh.f32 %v610_v20  ;;  %v1506_v20 = vld [vmem:[%s2102_s7 + $0x38] sm:$0xff] }
 0x1dc   : > { %1073 = vmatpush.bf16.msrb.mxu2 %v1506_v20 }
 0x1de   : > { %884 = vmatpush.bf16.msrb.mxu0 %v1487_v47  ;;  %1511 = vmatpush.bf16.msrb.mxu3 %v1487_v47 }
 0x1e1   : > { %v2000_v22 = vpop.eup %1623 }
 0x1e2   : > { %v616_v23 = vpack.c.bf16 %v2000_v22, %v1998_v21  ;;  %885 = vmatpush.bf16.msrb.mxu0 %v1486_v48  ;;  %1512 = vmatpush.bf16.msrb.mxu3 %v1486_v48 }
 0x1e4   : > { %700 = vmatmul.bf16.gmra.mxu2 %v616_v23  ;;  %v1504_v23 = vld [vmem:[%s2102_s7 + $0x28] sm:$0xff] }
 0x1e6   : > { %886 = vmatpush.bf16.msrb.mxu0 %v1485_v49  ;;  %1513 = vmatpush.bf16.msrb.mxu3 %v1485_v49 }
 0x1ea   : > { %887 = vmatpush.bf16.msrb.mxu0 %v1484_v50  ;;  %1514 = vmatpush.bf16.msrb.mxu3 %v1484_v50 }
 0x1ee   : > { %888 = vmatpush.bf16.msrb.mxu0 %v1483_v51  ;;  %1515 = vmatpush.bf16.msrb.mxu3 %v1483_v51 }
 0x257   : > { %v696_v29 = vpop.f32.mrf.mxu2 }
 0x258   : > { %v697_v32 = vadd.f32 %v1596_v30, %v696_v29 }
 0x25a   : > { %1625 = vtanh.f32 %v697_v32 }
 0x25f   : > { %v698_v34 = vpop.f32.mrf.mxu2 }
 0x260   : > { %v699_v35 = vadd.f32 %v1596_v30, %v698_v34  ;;  %v1626_v37 = vpop.eup %1625  ;;  %v1502_v34 = vld [vmem:[%s2102_s7 + $0x18] sm:$0xff] }
 0x262   : > { %1627 = vtanh.f32 %v699_v35  ;;  %v1501_v35 = vld [vmem:[%s2102_s7 + $0x10] sm:$0xff] }
 0x267   : > { %v701_v38 = vpop.f32.mrf.mxu2 }
 0x268   : > { %v1628_v39 = vpop.eup %1627  ;;  %v702_v41 = vadd.f32 %v1596_v30, %v701_v38  ;;  %v1599_v38 = vld [vmem:[%s2101_s6 + $0x2] ss:$0 sm:$0xff] }
 0x269   : > { %v710_v40 = vpack.c.bf16 %v1628_v39, %v1626_v37  ;;  %v1499_v37 = vld [vmem:[%s2102_s7] sm:$0xff] }
 0x26a   : > { %1629 = vtanh.f32 %v702_v41 }
 0x26b   : > { %790 = vmatmul.bf16.vlgmr.msra.gmra.mxu3 %v710_v40 }
 0x26f   : > { %v703_v42 = vpop.f32.mrf.mxu2 }
 0x270   : > { %v704_v43 = vadd.f32 %v1596_v30, %v703_v42  ;;  %v1630_v44 = vpop.eup %1629 }
 0x272   : > { %1631 = vtanh.f32 %v704_v43 }
 0x278   : > { %v1632_v45 = vpop.eup %1631 }
 0x279   : > { %v711_v46 = vpack.c.bf16 %v1632_v45, %v1630_v44 }
 0x27b   : > { %795 = vmatmul.bf16.gmra.mxu3 %v711_v46 }
 0x2ee   : > { %v791_v53 = vpop.f32.mrf.mxu3 }
 0x2ef   : > { %v792_v54 = vadd.f32 %v1597_v52, %v791_v53 }
 0x2f1   : > { %v801_v56 = vadd.f32 %v1990_v13, %v792_v54  ;;  %v1492_v13 = vld [vmem:[#allocation7 + $0x88] sm:$0xff] }
 0x2f2   : > { %982 = vmatpush.bf16.msrb.mxu1 %v1492_v13 }
 0x2f3   : > { %1633 = vtanh.f32 %v801_v56 }
 0x2f6   : > { %v793_v57 = vpop.f32.mrf.mxu3 }
 0x2f7   : > { %v794_v59 = vadd.f32 %v1597_v52, %v793_v57  ;;  %v1600_v57 = vld [vmem:[%s2103_s8] ss:$0 sm:$0xff] }
 0x2f9   : > { %v802_v60 = vadd.f32 %v1992_v14, %v794_v59  ;;  %v2012_v63 = vpop.eup %1633  ;;  %v1491_v14 = vld [vmem:[#allocation7 + $0x80] sm:$0xff] }
 0x2fa   : > { %983 = vmatpush.bf16.msrb.mxu1 %v1491_v14 }
 0x2fb   : > { %1635 = vtanh.f32 %v802_v60 }
 0x2fe   : > { %v796_v62 = vpop.f32.mrf.mxu3 }
 0x2ff   : > { %v797_v1 = vadd.f32 %v1597_v52, %v796_v62 }
 0x301   : > { %v2014_v0 = vpop.eup %1635  ;;  %v803_v3 = vadd.f32 %v1998_v21, %v797_v1  ;;  %v1505_v21 = vld [vmem:[%s2102_s7 + $0x30] sm:$0xff] }
 0x302   : > { %v809_v2 = vpack.c.bf16 %v2014_v0, %v2012_v63  ;;  %1074 = vmatpush.bf16.msrb.mxu2 %v1505_v21 }
 0x303   : > { %1637 = vtanh.f32 %v803_v3 }
 0x304   : > { %889 = vmatmul.bf16.vlgmr.msrb.gmra.mxu0 %v809_v2 }
 0x306   : > { %v798_v4 = vpop.f32.mrf.mxu3  ;;  %1075 = vmatpush.bf16.msrb.mxu2 %v1504_v23 }
 0x307   : > { %v799_v5 = vadd.f32 %v1597_v52, %v798_v4 }
 0x309   : > { %v804_v6 = vadd.f32 %v2000_v22, %v799_v5  ;;  %v2020_v7 = vpop.eup %1637 }
 0x30a   : > { %1076 = vmatpush.bf16.msrb.mxu2 %v1503_v33 }
 0x30b   : > { %1639 = vtanh.f32 %v804_v6 }
 0x30e   : > { %1077 = vmatpush.bf16.msrb.mxu2 %v1502_v34 }
 0x311   : > { %v2022_v8 = vpop.eup %1639 }
 0x312   : > { %v810_v9 = vpack.c.bf16 %v2022_v8, %v2020_v7  ;;  %1078 = vmatpush.bf16.msrb.mxu2 %v1501_v35 }
 0x314   : > { %894 = vmatmul.bf16.vlgmr.msrb.gmra.mxu3 %v810_v9 }
 0x316   : > { %1079 = vmatpush.bf16.msrb.mxu2 %v1500_v36 }
 0x31a   : > { %1080 = vmatpush.bf16.msrb.mxu2 %v1499_v37 }
 0x381   : > { %v890_v15 = vpop.f32.mrf.mxu0 }
 0x382   : > { %v891_v17 = vadd.f32 %v1598_v16, %v890_v15 }
 0x384   : > { %1641 = vtanh.f32 %v891_v17 }
 0x389   : > { %v892_v18 = vpop.f32.mrf.mxu0 }
 0x38a   : > { %v893_v19 = vadd.f32 %v1598_v16, %v892_v18  ;;  %v1642_v22 = vpop.eup %1641 }
 0x38c   : > { %1643 = vtanh.f32 %v893_v19 }
 0x392   : > { %v1644_v24 = vpop.eup %1643 }
 0x393   : > { %v904_v25 = vpack.c.bf16 %v1644_v24, %v1642_v22 }
 0x395   : > { %984 = vmatmul.bf16.vlgmr.msrb.gmra.mxu1 %v904_v25 }
 0x397   : > { %v895_v26 = vpop.f32.mrf.mxu3 }
 0x398   : > { %v896_v27 = vadd.f32 %v1598_v16, %v895_v26 }
 0x39a   : > { %1645 = vtanh.f32 %v896_v27 }
 0x39f   : > { %v897_v28 = vpop.f32.mrf.mxu3 }
 0x3a0   : > { %v898_v29 = vadd.f32 %v1598_v16, %v897_v28  ;;  %v1646_v30 = vpop.eup %1645 }
 0x3a2   : > { %1647 = vtanh.f32 %v898_v29 }
 0x3a8   : > { %v1648_v31 = vpop.eup %1647 }
 0x3a9   : > { %v905_v32 = vpack.c.bf16 %v1648_v31, %v1646_v30 }
 0x3ab   : > { %989 = vmatmul.bf16.gmra.mxu1 %v905_v32 }
 0x412   : > { %v985_v39 = vpop.f32.mrf.mxu1 }
 0x413   : > { %v986_v40 = vadd.f32 %v1599_v38, %v985_v39 }
 0x415   : > { %v995_v41 = vadd.f32 %v2012_v63, %v986_v40 }
 0x417   : > { %1649 = vtanh.f32 %v995_v41 }
 0x41a   : > { %v987_v42 = vpop.f32.mrf.mxu1 }
 0x41b   : > { %v988_v43 = vadd.f32 %v1599_v38, %v987_v42 }
 0x41d   : > { %v996_v44 = vadd.f32 %v2014_v0, %v988_v43  ;;  %v1650_v45 = vpop.eup %1649 }
 0x41f   : > { %1651 = vtanh.f32 %v996_v44 }
 0x425   : > { %v1652_v46 = vpop.eup %1651 }
 0x426   : > { %v1003_v47 = vpack.c.bf16 %v1652_v46, %v1650_v45 }
 0x428   : > { %v990_v48 = vpop.f32.mrf.mxu1  ;;  %1081 = vmatmul.bf16.vlgmr.msrb.gmra.mxu2 %v1003_v47 }
 0x429   : > { %v991_v49 = vadd.f32 %v1599_v38, %v990_v48 }
 0x42b   : > { %v997_v50 = vadd.f32 %v2020_v7, %v991_v49 }
 0x42d   : > { %1653 = vtanh.f32 %v997_v50 }
 0x430   : > { %v992_v51 = vpop.f32.mrf.mxu1 }
 0x431   : > { %v993_v52 = vadd.f32 %v1599_v38, %v992_v51 }
 0x433   : > { %v998_v53 = vadd.f32 %v2022_v8, %v993_v52  ;;  %v1654_v54 = vpop.eup %1653 }
 0x435   : > { %1655 = vtanh.f32 %v998_v53 }
 0x43b   : > { %v1656_v55 = vpop.eup %1655 }
 0x43c   : > { %v1004_v56 = vpack.c.bf16 %v1656_v55, %v1654_v54 }
 0x43e   : > { %1086 = vmatmul.bf16.gmra.mxu2 %v1004_v56 }
 0x4ab   : > { %v1082_v58 = vpop.f32.mrf.mxu2 }
 0x4ac   : > { %v1083_v59 = vadd.f32 %v1600_v57, %v1082_v58 }
 0x4ae   : > { %1092 = vst [vmem:[%s374_s25] sm:$0xff] %v1083_v59 }
 0x4b3   : > { %v1084_v60 = vpop.f32.mrf.mxu2 }
 0x4b4   : > { %v1085_v61 = vadd.f32 %v1600_v57, %v1084_v60 }
 0x4b6   : > { %1093 = vst [vmem:[%s374_s25 + $0x8] sm:$0xff] %v1085_v61 }
 0x4c1   : > { %v1087_v62 = vpop.f32.mrf.mxu2 }
 0x4c2   : > { %v1088_v63 = vadd.f32 %v1600_v57, %v1087_v62 }
 0x4c4   : > { %1094 = vst [vmem:[%s374_s25 + $0x10] sm:$0xff] %v1088_v63 }
 0x4c9   : > { %v1089_v0 = vpop.f32.mrf.mxu2 }
 0x4ca   : > { %v1090_v1 = vadd.f32 %v1600_v57, %v1089_v0 }
 0x4cc   : > { %1095 = vst [vmem:[%s374_s25 + $0x18] sm:$0xff] %v1090_v1 }
 0x4cd   : > { %1774 = shalt.err (!%p1771_p8)
}
 0x4ce   : > { %s1825_s16 = smov 128   ;;  %s1826_s25 = smov 8  }
 0x4cf   : > { %1528 = dma.vmem_to_hbm [thread:$0]  (%p1915_p5), %s1110_s21, 512, %s1112_s24, %s1097_s26, %s1825_s16, %s1825_s16, %s1826_s25  }
 0x4d0 PF: > { %p1550_p9 = scmp.ge.s32.totalorder %s1817_s12, 2  ;;  %s1126_s29 = sand.u32 1, %s1805_s30  }
 0x4d1   : > { %s1127_s3 = scalar_lea.sflag [#allocation4], %s1126_s29 }
 0x4d2   : > { %p1541_p10 = pnand %p1550_p9, %p1919_p6 }
 0x4d4   : > { %p1542_p11 = pneg %p1541_p10 }
 0x4d6   : > { %1800 = dma.done.wait (%p1542_p11), %s1127_s3, 512  }
 0x4d7   : > { %1802 = vsyncadd (%p1542_p11), %s1127_s3, 4294966784  ;;  %s2112_s18 = sld [smem:[#allocation12_spill]]  ;;  %p21_p12 = scmp.ge.s32.totalorder %s1902_s15, 4  }
 0x4d8   : > { %s2113_s30 = smov %s1809_s10  ;;  %s2114_s10 = smov %s1813_s11 }
 0x4d9   : > { %s2116_s12 = smov %s1902_s15  ;;  %23 = sbr.rel (!%p21_p12) target bundleno = 7 (0x7), region = 112 }
 0x4dd   : > { %s2115_s11 = smov %s2112_s18 }
 0x4de   :  { %1133 = vsyncpa [#allocation3], 1 }
 0x4df   :  { %1135 = vsyncpa [#allocation3 + $0x1], 1 }
 0x4e0   :  { %1136 = vsyncpa [#allocation6], 1 }
 0x4e1   :  { %1137 = vsyncpa [#allocation4], 1 }
 0x4e2   :  { %1139 = vsyncpa [#allocation4 + $0x1], 1 }

</bundles_post_ra>
